<compile_context>
chip_gen: v6e
topology: v6e:2x2x1
jax: 0.10.0
libtpu: 0.0.40
codegen_flags: <defaults>
</compile_context>

<pallas_src>
import jax
import jax.numpy as jnp
from jax.experimental import pallas as pl
from jax.experimental.pallas import tpu as pltpu

IN_DIM = 256
HID_DIM = 128
OUT_DIM = 4
OUT_PAD = 8  # narrow padded output width (block last dim == full array dim is legal)


def dqn_kernel(x_ref, w1_ref, b1_ref, w2_ref, b2_ref, w3_ref, b3_ref, o_ref):
    # In-kernel bf16 cast of the streamed input (hidden under the MXU work).
    x_bf = x_ref[...].astype(jnp.bfloat16)
    # Layer 1: Linear(256, 128) + ReLU  (bf16 MXU matmul, f32 accumulate + VPU epilogue)
    h1 = jnp.dot(x_bf, w1_ref[...], preferred_element_type=jnp.float32)
    h1 = jnp.maximum(h1 + b1_ref[...], 0.0)
    # Layer 2: Linear(128, 128) + ReLU
    h2 = jnp.dot(h1.astype(jnp.bfloat16), w2_ref[...],
                 preferred_element_type=jnp.float32)
    h2 = jnp.maximum(h2 + b2_ref[...], 0.0)
    # Layer 3: Linear(128, 8-padded-from-4), no activation.
    o_ref[...] = jnp.dot(h2.astype(jnp.bfloat16), w3_ref[...],
                         preferred_element_type=jnp.float32) + b3_ref[...]


def prepare_dqn_params(w1, b1, w2, b2, w3, b3):
    """One-time weight preprocessing, hoisted off the per-call hot path.

    Weights stored [in, out] (transposed vs PyTorch's [out, in]); biases become
    lane-aligned (1, out) f32 rows; final layer is zero-padded from 4 to OUT_PAD cols.
    """
    w1_bf = w1.astype(jnp.bfloat16)
    w2_bf = w2.astype(jnp.bfloat16)
    w3_pad = jnp.zeros((HID_DIM, OUT_PAD), jnp.bfloat16).at[:, :OUT_DIM].set(
        w3.astype(jnp.bfloat16))
    b3_pad = jnp.zeros((1, OUT_PAD), jnp.float32).at[:, :OUT_DIM].set(
        b3.reshape(1, OUT_DIM).astype(jnp.float32))
    return (w1_bf, b1.reshape(1, HID_DIM).astype(jnp.float32),
            w2_bf, b2.reshape(1, HID_DIM).astype(jnp.float32),
            w3_pad, b3_pad)


def dqn_forward(x, params, *, tb=512):
    """x: [B, 256] f32, params from prepare_dqn_params(). Returns [B, 4] f32 Q-values."""
    w1_bf, b1, w2_bf, b2, w3_pad, b3_pad = params
    B = x.shape[0]

    # Clamp the batch tile to the 8-aligned batch; large B keeps the requested tb.
    # (On v7x, pick tb so grid_b = cdiv(B, tb) is >= 2 and even to feed both TensorCores.)
    tb_eff = min(tb, ((B + 7) // 8) * 8)
    grid_b = pl.cdiv(B, tb_eff)

    resident = lambda i: (0, 0)  # weights/biases: same block every step -> fetched once

    out_padded = pl.pallas_call(
        dqn_kernel,
        out_shape=jax.ShapeDtypeStruct((B, OUT_PAD), jnp.float32),
        grid_spec=pltpu.PrefetchScalarGridSpec(
            num_scalar_prefetch=0,
            grid=(grid_b,),
            in_specs=[
                # x tile: pipelined (double-buffered); last grid step may be partial.
                # (If xprof shows exposed input DMA, add pipeline_mode=pl.Buffered(3).)
                pl.BlockSpec((tb_eff, IN_DIM), lambda i: (i, 0)),
                pl.BlockSpec((IN_DIM, HID_DIM), resident),   # w1 (bf16)
                pl.BlockSpec((1, HID_DIM), resident),        # b1 (f32)
                pl.BlockSpec((HID_DIM, HID_DIM), resident),  # w2 (bf16)
                pl.BlockSpec((1, HID_DIM), resident),        # b2 (f32)
                pl.BlockSpec((HID_DIM, OUT_PAD), resident),  # w3 (bf16, padded to 8)
                pl.BlockSpec((1, OUT_PAD), resident),        # b3 (f32, padded to 8)
            ],
            out_specs=pl.BlockSpec((tb_eff, OUT_PAD), lambda i: (i, 0)),
        ),
        compiler_params=pltpu.CompilerParams(
            dimension_semantics=("parallel",),
        ),
    )(x, w1_bf, b1, w2_bf, b2, w3_pad, b3_pad)

    return out_padded[:, :OUT_DIM]


def init_linear(key, in_f, out_f):
    # PyTorch nn.Linear default init: U(-1/sqrt(in_f), 1/sqrt(in_f)) for W and b.
    kw, kb = jax.random.split(key)
    bound = 1.0 / (in_f ** 0.5)
    # Stored as [in_f, out_f] (transposed relative to PyTorch's [out, in]).
    w = jax.random.uniform(kw, (in_f, out_f), jnp.float32, -bound, bound)
    b = jax.random.uniform(kb, (1, out_f), jnp.float32, -bound, bound)
    return w, b


def reference_forward_f32(x, w1, b1, w2, b2, w3, b3):
    h1 = jnp.maximum(x @ w1 + b1, 0.0)
    h2 = jnp.maximum(h1 @ w2 + b2, 0.0)
    return h2 @ w3 + b3


def reference_forward_bf16(x, w1, b1, w2, b2, w3, b3):
    # Mirrors the kernel's dtype choices exactly (bf16 operands, f32 accumulate/epilogue).
    bf = jnp.bfloat16
    h1 = jnp.dot(x.astype(bf), w1.astype(bf), preferred_element_type=jnp.float32)
    h1 = jnp.maximum(h1 + b1, 0.0)
    h2 = jnp.dot(h1.astype(bf), w2.astype(bf), preferred_element_type=jnp.float32)
    h2 = jnp.maximum(h2 + b2, 0.0)
    return jnp.dot(h2.astype(bf), w3.astype(bf), preferred_element_type=jnp.float32) + b3


if __name__ == "__main__":
    key = jax.random.PRNGKey(0)
    kx, k1, k2, k3 = jax.random.split(key, 4)

    B = 200  # not a multiple of the batch tile -> exercises the partial-tail-block path
    x = jax.random.normal(kx, (B, IN_DIM), jnp.float32)

    w1, b1 = init_linear(k1, IN_DIM, HID_DIM)
    w2, b2 = init_linear(k2, HID_DIM, HID_DIM)
    w3, b3 = init_linear(k3, HID_DIM, OUT_DIM)

    params = prepare_dqn_params(w1, b1, w2, b2, w3, b3)

    # Multi-step grid (tb=128 -> 2 steps, last one partial).
    out = dqn_forward(x, params, tb=128)
    out = jax.block_until_ready(out)
    assert out.shape == (B, OUT_DIM)

    # Single-step grid with the (clamped) default tile; must match.
    out_single = jax.block_until_ready(dqn_forward(x, params))
    assert jnp.allclose(out, out_single, atol=1e-5, rtol=1e-5), "tile-size mismatch"

    # Tight check vs. a reference with identical bf16 operand casts.
    ref_bf16 = reference_forward_bf16(x, w1, b1, w2, b2, w3, b3)
    assert jnp.allclose(out, ref_bf16, atol=1e-3, rtol=1e-3), "mismatch vs bf16 reference"

    # Loose sanity check vs. the full-f32 PyTorch-equivalent forward.
    ref_f32 = reference_forward_f32(x, w1, b1, w2, b2, w3, b3)
    assert jnp.allclose(out, ref_f32, atol=5e-2, rtol=5e-2), "mismatch vs f32 reference"

    print("KERNEL_OK")
</pallas_src>

<mosaic_0001>
module attributes {stable_mosaic.version = 11 : i64} {
  func.func @dqn_kernel(%arg0: i32, %arg1: memref<128x256xf32, #tpu.memory_space<vmem>>, %arg2: memref<256x128xbf16, #tpu.memory_space<vmem>>, %arg3: memref<1x128xf32, #tpu.memory_space<vmem>>, %arg4: memref<128x128xbf16, #tpu.memory_space<vmem>>, %arg5: memref<1x128xf32, #tpu.memory_space<vmem>>, %arg6: memref<128x8xbf16, #tpu.memory_space<vmem>>, %arg7: memref<1x8xf32, #tpu.memory_space<vmem>>, %arg8: memref<128x8xf32, #tpu.memory_space<vmem>>) attributes {dimension_semantics = [#tpu.dimension_semantics<parallel>], iteration_bounds = array<i64: 2>, scalar_prefetch = 0 : i64, scratch_operands = 0 : i64, tpu.core_type = #tpu.core_type<tc>, window_params = [{transform_indices = @transform_0, window_bounds = array<i64: 128, 256>}, {pipeline_mode = #tpu.pipeline_mode<synchronous>, transform_indices = @transform_1, window_bounds = array<i64: 256, 128>}, {pipeline_mode = #tpu.pipeline_mode<synchronous>, transform_indices = @transform_2, window_bounds = array<i64: 1, 128>}, {pipeline_mode = #tpu.pipeline_mode<synchronous>, transform_indices = @transform_3, window_bounds = array<i64: 128, 128>}, {pipeline_mode = #tpu.pipeline_mode<synchronous>, transform_indices = @transform_4, window_bounds = array<i64: 1, 128>}, {pipeline_mode = #tpu.pipeline_mode<synchronous>, transform_indices = @transform_5, window_bounds = array<i64: 128, 8>}, {pipeline_mode = #tpu.pipeline_mode<synchronous>, transform_indices = @transform_6, window_bounds = array<i64: 1, 8>}, {transform_indices = @transform_7, window_bounds = array<i64: 128, 8>}]} {
    %c0 = arith.constant 0 : index
    %c0_0 = arith.constant 0 : index
    %0 = vector.load %arg1[%c0, %c0_0] : memref<128x256xf32, #tpu.memory_space<vmem>>, vector<128x256xf32>
    %1 = arith.truncf %0 : vector<128x256xf32> to vector<128x256xbf16>
    %c0_1 = arith.constant 0 : index
    %c0_2 = arith.constant 0 : index
    %2 = vector.load %arg2[%c0_1, %c0_2] : memref<256x128xbf16, #tpu.memory_space<vmem>>, vector<256x128xbf16>
    %cst = arith.constant dense<0.000000e+00> : vector<128x128xf32>
    %3 = tpu.matmul %1, %2, %cst {dimension_numbers = #tpu.dot_dimension_numbers<[1], [0], [0], [1], [0, 0, 1, 1], [], []>} : vector<128x256xbf16>, vector<256x128xbf16>, vector<128x128xf32> -> vector<128x128xf32>
    %c0_3 = arith.constant 0 : index
    %c0_4 = arith.constant 0 : index
    %4 = vector.load %arg3[%c0_3, %c0_4] : memref<1x128xf32, #tpu.memory_space<vmem>>, vector<1x128xf32>
    %5 = vector.broadcast %4 : vector<1x128xf32> to vector<128x128xf32>
    %6 = arith.addf %3, %5 : vector<128x128xf32>
    %cst_5 = arith.constant 0.000000e+00 : f32
    %7 = vector.broadcast %cst_5 : f32 to vector<128x128xf32>
    %8 = arith.maximumf %6, %7 : vector<128x128xf32>
    %9 = arith.truncf %8 : vector<128x128xf32> to vector<128x128xbf16>
    %c0_6 = arith.constant 0 : index
    %c0_7 = arith.constant 0 : index
    %10 = vector.load %arg4[%c0_6, %c0_7] : memref<128x128xbf16, #tpu.memory_space<vmem>>, vector<128x128xbf16>
    %cst_8 = arith.constant dense<0.000000e+00> : vector<128x128xf32>
    %11 = tpu.matmul %9, %10, %cst_8 {dimension_numbers = #tpu.dot_dimension_numbers<[1], [0], [0], [1], [0, 0, 1, 1], [], []>} : vector<128x128xbf16>, vector<128x128xbf16>, vector<128x128xf32> -> vector<128x128xf32>
    %c0_9 = arith.constant 0 : index
    %c0_10 = arith.constant 0 : index
    %12 = vector.load %arg5[%c0_9, %c0_10] : memref<1x128xf32, #tpu.memory_space<vmem>>, vector<1x128xf32>
    %13 = vector.broadcast %12 : vector<1x128xf32> to vector<128x128xf32>
    %14 = arith.addf %11, %13 : vector<128x128xf32>
    %cst_11 = arith.constant 0.000000e+00 : f32
    %15 = vector.broadcast %cst_11 : f32 to vector<128x128xf32>
    %16 = arith.maximumf %14, %15 : vector<128x128xf32>
    %17 = arith.truncf %16 : vector<128x128xf32> to vector<128x128xbf16>
    %c0_12 = arith.constant 0 : index
    %c0_13 = arith.constant 0 : index
    %18 = vector.load %arg6[%c0_12, %c0_13] : memref<128x8xbf16, #tpu.memory_space<vmem>>, vector<128x8xbf16>
    %cst_14 = arith.constant dense<0.000000e+00> : vector<128x8xf32>
    %19 = tpu.matmul %17, %18, %cst_14 {dimension_numbers = #tpu.dot_dimension_numbers<[1], [0], [0], [1], [0, 0, 1, 1], [], []>} : vector<128x128xbf16>, vector<128x8xbf16>, vector<128x8xf32> -> vector<128x8xf32>
    %c0_15 = arith.constant 0 : index
    %c0_16 = arith.constant 0 : index
    %20 = vector.load %arg7[%c0_15, %c0_16] : memref<1x8xf32, #tpu.memory_space<vmem>>, vector<1x8xf32>
    %21 = vector.broadcast %20 : vector<1x8xf32> to vector<128x8xf32>
    %22 = arith.addf %19, %21 : vector<128x8xf32>
    %c0_17 = arith.constant 0 : index
    %c0_18 = arith.constant 0 : index
    %23 = vector.load %arg8[%c0_17, %c0_18] : memref<128x8xf32, #tpu.memory_space<vmem>>, vector<128x8xf32>
    tpu.vector_store %arg8[%c0_17, %c0_18], %22 {strides = array<i32>} : memref<128x8xf32, #tpu.memory_space<vmem>>, vector<128x8xf32>,
    return
  }
  func.func @transform_0(%arg0: i32) -> (i32, i32) {
    %c0_i32 = arith.constant 0 : i32
    %c0_i32_0 = arith.constant 0 : i32
    return %arg0, %c0_i32 : i32, i32
  }
  func.func @transform_1(%arg0: i32) -> (i32, i32) {
    %c0_i32 = arith.constant 0 : i32
    %c0_i32_0 = arith.constant 0 : i32
    %c0_i32_1 = arith.constant 0 : i32
    return %c0_i32, %c0_i32_0 : i32, i32
  }
  func.func @transform_2(%arg0: i32) -> (i32, i32) {
    %c0_i32 = arith.constant 0 : i32
    %c0_i32_0 = arith.constant 0 : i32
    %c0_i32_1 = arith.constant 0 : i32
    return %c0_i32, %c0_i32_0 : i32, i32
  }
  func.func @transform_3(%arg0: i32) -> (i32, i32) {
    %c0_i32 = arith.constant 0 : i32
    %c0_i32_0 = arith.constant 0 : i32
    %c0_i32_1 = arith.constant 0 : i32
    return %c0_i32, %c0_i32_0 : i32, i32
  }
  func.func @transform_4(%arg0: i32) -> (i32, i32) {
    %c0_i32 = arith.constant 0 : i32
    %c0_i32_0 = arith.constant 0 : i32
    %c0_i32_1 = arith.constant 0 : i32
    return %c0_i32, %c0_i32_0 : i32, i32
  }
  func.func @transform_5(%arg0: i32) -> (i32, i32) {
    %c0_i32 = arith.constant 0 : i32
    %c0_i32_0 = arith.constant 0 : i32
    %c0_i32_1 = arith.constant 0 : i32
    return %c0_i32, %c0_i32_0 : i32, i32
  }
  func.func @transform_6(%arg0: i32) -> (i32, i32) {
    %c0_i32 = arith.constant 0 : i32
    %c0_i32_0 = arith.constant 0 : i32
    %c0_i32_1 = arith.constant 0 : i32
    return %c0_i32, %c0_i32_0 : i32, i32
  }
  func.func @transform_7(%arg0: i32) -> (i32, i32) {
    %c0_i32 = arith.constant 0 : i32
    %c0_i32_0 = arith.constant 0 : i32
    return %arg0, %c0_i32 : i32, i32
  }
}

</mosaic_0001>

<bundles_post_ra>
// kernel: tpu_custom_call.1
= control target key start
LH: loop header
LB: loop body
LE: loop exit
PB: predicated region body
PF: predicated region fallthrough
CT: control target
= control target key end

     0   :  { %12 = vsyncpa [#allocation3], 0  ;;  %s2256_s0 = inlined_call_operand.hbm [shape: f32[200,256], index: 0, kind: input, shape index: {}]   ;;  %s2257_s1 = inlined_call_operand.hbm [shape: bf16[256,128], index: 1, kind: input, shape index: {}]   ;;  %s2258_s2 = inlined_call_operand.vmem [shape: f32[1,128], index: 2, kind: input, shape index: {}]   ;;  %s2259_s3 = inlined_call_operand.vmem [shape: bf16[128,128], index: 3, kind: input, shape index: {}]   ;;  %s2260_s4 = inlined_call_operand.vmem [shape: f32[1,128], index: 4, kind: input, shape index: {}]   ;;  %s2261_s5 = inlined_call_operand.vmem [shape: bf16[128,8], index: 5, kind: input, shape index: {}]   ;;  %s2262_s6 = inlined_call_operand.vmem [shape: f32[1,8], index: 6, kind: input, shape index: {}]   ;;  %s2263_s7 = inlined_call_operand.vmem [shape: f32[200,8], index: 7, kind: output, shape index: {}]  }
   0x1   :  { %14 = vsyncpa [#allocation3 + $0x1], 0 }
   0x2   :  { %15 = vsyncpa [#allocation5], 0  ;;  %s1887_s24 = smov 0   ;;  %s1889_s25 = smov 0  }
   0x3   :  { %s1891_s26 = smov 0   ;;  %s1893_s27 = smov 0  }
   0x4 LB: > { %s1906_s28 = sadd.s32 4294967295, %s1807_s27   ;;  %s1909_s29 = sadd.s32 1, %s1807_s27   ;;  %s1807_s27 = sphi %s1893_s27, %s2277_s27   ;;  %s1803_s26 = sphi %s1891_s26, %s2276_s26   ;;  %s1799_s25 = sphi %s1889_s25, %s2275_s25   ;;  %s1795_s24 = sphi %s1887_s24, %s2274_s24  }
   0x5   : > { %s25_s30 = ssub.s32 %s1807_s27, %s1909_s29  ;;  %s28_s8 = sadd.s32 1, %s1803_s26 }
   0x6   : > { %p26_p0 = scmp.eq.s32.totalorder %s25_s30, 0  ;;  %p35_p1 = scmp.ne.s32.totalorder %s1803_s26, %s1799_s25 }
   0x7   : > { %p36_p2 = scmp.eq.s32.totalorder %s1807_s27, 0  ;;  %p41_p3 = scmp.ne.s32.totalorder %s1799_s25, %s1795_s24 }
   0x8   : > { %s1919_s9 = scalar_select %p26_p0, %s1803_s26, %s28_s8  }
   0x9   : > { %p1921_p4 = por %p36_p2, %p35_p1  ;;  %p42_p5 = scmp.eq.s32.totalorder %s1906_s28, 0 }
   0xa   : > { %p191_p6 = scmp.eq.s32.totalorder %s1906_s28, 1  ;;  %p1307_p7 = scmp.ge.s32.totalorder %s1807_s27, 1 }
   0xb   : > { %p1930_p8 = por %p42_p5, %p41_p3  ;;  %p204_p9 = scmp.lt.s32.totalorder %s1807_s27, 3 }
   0xc   : > { %p1935_p10 = por %p191_p6, %p35_p1  ;;  %s1841_s14 = smov [#allocation4]  }
   0xd   : > { %s2266_s11 = scalar_select %p1930_p8, 1, 0 }
   0xe   : > { %s2267_s12 = scalar_select %p1935_p10, 1, 0 }
   0xf   : > { %p1939_p11 = pnand %p1307_p7, %p204_p9  ;;  %s216_s15 = sshll.u32 %s1841_s14, 4  ;;  %s217_s15 = int_to_ptr.vmem [resolvable:$true] %s216_s15 }
  0x10   : > { %s1696_s16 = scalar_lea.vmem %s217_s15, 2048  ;;  %p1704_p6 = scmp.lt.s32.totalorder %s217_s15, %s217_s15 }
  0x11   : > { %p1546_p12 = pneg %p1939_p11  ;;  %p1697_p2 = scmp.ne.s32.totalorder %s217_s15, %s1696_s16 }
  0x12   : > { %p1705_p8 = scmp.lt.s32.totalorder %s1696_s16, %s1696_s16 }
  0x13   : > { %p1547_p13 = pnand %p1546_p12, %p42_p5 }
  0x14   : > { %p1706_p10 = por %p1705_p8, %p1704_p6 }
  0x15   : > { %p1687_p0 = pneg %p1547_p13 }
  0x17   : > { %p1699_p3 = pnand %p1697_p2, %p1687_p0 }
  0x19   : > { %p1700_p1 = pneg %p1699_p3 }
  0x1b   : > { %p1707_p7 = pnand %p1706_p10, %p1700_p1 }
  0x1d   : > { %1710 = shalt.err (!%p1707_p7)
}
  0x1e   : > { %s1842_s17 = smov 64   ;;  %s1843_s18 = smov 4  }
  0x1f   : > { %1549 = dma.hbm_to_vmem [thread:$0]  (!%p1547_p13), %s2257_s1, 2048, %s217_s15, [#allocation5], %s1842_s17, %s1842_s17, %s1843_s18  }
  0x20   : > { %p1309_p9 = scmp.ge.s32.totalorder %s1807_s27, 2 }
  0x22   : > { %241 = sbr.rel (%p1309_p9) target bundleno = 71 (0x47), region = 40 }
  0x27   : > { %244 = sbr.rel (!%p1921_p4) target bundleno = 71 (0x47), region = 44  ;;  %s245_s21 = sand.u32 (%p1921_p4), 1, %s1803_s26  }
  0x28   : > { %s1311_s22 = sshll.u32 (%p1921_p4), %s1807_s27, 4  ;;  %s1310_s23 = sshll.u32 (%p1921_p4), %s245_s21, 8 }
  0x29   : > { %s251_s24 = ssub.s32 (%p1921_p4), 25, %s1311_s22  ;;  %s1958_s14 = scalar_lea.sflag (%p1921_p4), [#allocation3], %s245_s21 }
  0x2a   : > { %p252_p8 = scmp.lt.s32.totalorder (%p1921_p4), %s251_s24, 16  ;;  %s249_s15 = scalar_lea.vmem (%p1921_p4), [#allocation2], %s1310_s23 }
  0x2c   : > { %s2279_s24 = smov (!%p252_p8, %s251_s24), 16 }
  0x2d   : > { %s1955_s30 = sshll.u32 %s2279_s24, 8 }
  0x2e   : > { %s257_s8 = ssub.s32 4096, %s1955_s30 }
  0x2f   : > { %258 = vsyncadd %s1958_s14, %s257_s8  ;;  %p1314_p4 = scmp.ne.s32.totalorder %s1955_s30, 0  ;;  %s1377_s10 = sshll.u32 %s1807_s27, 12 }
  0x30   : > { %s1966_s18 = scalar_lea.hbm %s2256_s0, %s1377_s10  ;;  %s264_s19 = sshll.u32 %s249_s15, 4  ;;  %s1968_s19 = int_to_ptr.vmem [resolvable:$true] %s264_s19 }
  0x31   : > { %s1711_s20 = scalar_lea.hbm %s1966_s18, %s1955_s30  ;;  %s1715_s27 = scalar_lea.hbm %s2256_s0, 6400 }
  0x32   : > { %p1712_p10 = scmp.ne.s32.totalorder %s1966_s18, %s1711_s20  ;;  %p1716_p0 = scmp.lt.s32.totalorder %s1966_s18, %s2256_s0 }
  0x33   : > { %p1717_p2 = scmp.lt.s32.totalorder %s1715_s27, %s1711_s20 }
  0x34   : > { %p1713_p12 = pnand %p1712_p10, %p1314_p4 }
  0x35   : > { %p1718_p3 = por %p1717_p2, %p1716_p0 }
  0x36   : > { %p1714_p13 = pneg %p1713_p12 }
  0x38   : > { %p1719_p1 = pnand %p1718_p3, %p1714_p13 }
  0x3a   : > { %1722 = shalt.err (!%p1719_p1)
}
  0x3b   : > { %s1723_s8 = scalar_lea.vmem %s1968_s19, %s1955_s30  ;;  %s1844_s15 = smov [#allocation2]  }
  0x3c   : > { %p1724_p6 = scmp.ne.s32.totalorder %s1968_s19, %s1723_s8  ;;  %s1727_s10 = sshll.u32 %s1844_s15, 4  ;;  %s1728_s10 = int_to_ptr.vmem [resolvable:$false] %s1727_s10 }
  0x3d   : > { %s1729_s16 = scalar_lea.vmem %s1728_s10, 8192  ;;  %p1730_p8 = scmp.lt.s32.totalorder %s1968_s19, %s1728_s10 }
  0x3e   : > { %p1725_p7 = pnand %p1724_p6, %p1314_p4  ;;  %p1731_p10 = scmp.lt.s32.totalorder %s1729_s16, %s1723_s8 }
  0x40   : > { %p1726_p9 = pneg %p1725_p7  ;;  %p1732_p12 = por %p1731_p10, %p1730_p8 }
  0x42   : > { %p1733_p0 = pnand %p1732_p12, %p1726_p9 }
  0x44   : > { %1736 = shalt.err (!%p1733_p0)
}
  0x45   : > { %s1845_s17 = smov 256   ;;  %s1846_s20 = smov 16  }
  0x46   : > { %270 = dma.hbm_to_vmem [thread:$0]  (%p1314_p4), %s1966_s18, %s1955_s30, %s1968_s19, %s1958_s14, %s1845_s17, %s1845_s17, %s1846_s20  }
  0x47 PF: > { %276 = sbr.rel (%p1939_p11) target bundleno = 824 (0x338), region = 48  ;;  %s1997_s21 = sand.u32 (!%p1939_p11), 1, %s1799_s25  }
  0x48   : > { %s1320_s22 = sshll.u32 (!%p1939_p11), %s1997_s21, 8  ;;  %s279_s27 = scalar_lea.sflag (!%p1939_p11), [#allocation3], %s1997_s21 }
  0x49   : > { %s2001_s23 = scalar_lea.vmem (!%p1939_p11), [#allocation2], %s1320_s22  ;;  %p2269_p13 = scmp.ne.s32.totalorder (!%p1939_p11), %s2266_s11, 0 }
  0x4c   : > { %1786 = dma.done.wait (%p2269_p13), %s279_s27, 4096  }
  0x4d   : > { %1788 = vsyncadd (%p2269_p13), %s279_s27, 4294963200 }
  0x4e   : > { %1790 = dma.done.wait (%p42_p5), [#allocation5], 2048  }
  0x4f   : > { %1792 = vsyncadd (%p42_p5), [#allocation5], 4294965248  ;;  %v1653_v0 = vld [vmem:[#allocation4 + $0x78] sm:$0xff]   ;;  %v1655_v2 = vld [vmem:[#allocation4 + $0x70] sm:$0xff]   ;;  %s1322_s18 = sshll.u32 %s1997_s21, 7  ;;  %vm992_vm0 = vcmask 64512  }
  0x50   : > { %v1654_v1 = vld [vmem:[#allocation4 + $0x38] sm:$0xff]   ;;  %1381 = vmatprep.subr.bf16.mxu0 %v1653_v0  ;;  %v1656_v3 = vld [vmem:[#allocation4 + $0x30] sm:$0xff]   ;;  %v1657_v4 = vld [vmem:[#allocation4 + $0x68] sm:$0xff]   ;;  %s2119_s8 = scalar_lea.vmem [#allocation6], %s1322_s18   ;;  %p2270_p5 = scmp.ne.s32.totalorder %s2267_s12, 0 }
  0x51   : > { %1382 = vmatpush3.bf16.msra.mxu0 %v1654_v1  ;;  %v1658_v5 = vld [vmem:[#allocation4 + $0x28] sm:$0xff]   ;;  %v1659_v6 = vld [vmem:[#allocation4 + $0x60] sm:$0xff]   ;;  %v1661_v8 = vld [vmem:[#allocation4 + $0x58] sm:$0xff]   ;;  %s1359_s21 = sshll.u32 (%p2270_p5), %s1906_s28, 4  ;;  %s1378_s15 = sshll.u32 (%p2270_p5), %s1906_s28, 7 }
  0x52   : > { %1383 = vmatprep.subr.bf16.mxu0 %v1655_v2  ;;  %v1660_v7 = vld [vmem:[#allocation4 + $0x20] sm:$0xff]   ;;  %v1662_v9 = vld [vmem:[#allocation4 + $0x18] sm:$0xff]   ;;  %v1663_v10 = vld [vmem:[#allocation4 + $0x50] sm:$0xff]   ;;  %s1017_s10 = ssub.s32 (%p2270_p5), 25, %s1359_s21  ;;  %s2160_s20 = scalar_lea.vmem (%p2270_p5), %s2263_s7, %s1378_s15  }
  0x53   : > { %v329_v11 = vld [vmem:[%s2001_s23 + $0x8] sm:$0xff]  ;;  %v331_v12 = vld [vmem:[%s2001_s23 + $0x18] sm:$0xff]  ;;  %v1664_v14 = vld [vmem:[#allocation4 + $0x10] sm:$0xff]   ;;  %p1018_p11 = scmp.lt.s32.totalorder (%p2270_p5), %s1017_s10, 16 }
  0x54   : > { %v361_v13 = vpack.c.bf16 %v331_v12, %v329_v11  ;;  %v1665_v15 = vld [vmem:[#allocation4 + $0x48] sm:$0xff]   ;;  %v1667_v17 = vld [vmem:[#allocation4 + $0x40] sm:$0xff]   ;;  %v330_v20 = vld [vmem:[%s2001_s23 + $0x10] sm:$0xff] }
  0x55   : > { %1384 = vmatpush3.bf16.msra.mxu0 %v1656_v3  ;;  %v1666_v16 = vld [vmem:[#allocation4 + $0x8] sm:$0xff]   ;;  %v1668_v18 = vld [vmem:[#allocation4] sm:$0xff]   ;;  %v335_v22 = vld [vmem:[%s2001_s23 + $0x38] sm:$0xff] }
  0x56   : > { %1385 = vmatprep.subr.bf16.mxu0 %v1657_v4  ;;  %543 = vmatprep.mubr.bf16.mxu0 %v361_v13  ;;  %v328_v19 = vld [vmem:[%s2001_s23] sm:$0xff]  ;;  %v333_v21 = vld [vmem:[%s2001_s23 + $0x28] sm:$0xff]  ;;  %v1669_v23 = vld [vmem:[%s2259_s3 + $0x38] sm:$0xff]  }
  0x57   : > { %v1670_v24 = vld [vmem:[%s2259_s3 + $0x30] sm:$0xff]   ;;  %1477 = vmatprep.subr.bf16.mxu1 %v1669_v23  ;;  %v1671_v25 = vld [vmem:[%s2259_s3 + $0x28] sm:$0xff]   ;;  %v360_v26 = vpack.c.bf16 %v330_v20, %v328_v19  ;;  %v363_v27 = vpack.c.bf16 %v335_v22, %v333_v21  ;;  %v332_v28 = vld [vmem:[%s2001_s23 + $0x20] sm:$0xff] }
  0x58   : > { %1478 = vmatpush3.bf16.msra.mxu1 %v1669_v23  ;;  %v334_v29 = vld [vmem:[%s2001_s23 + $0x30] sm:$0xff]  ;;  %v337_v30 = vld [vmem:[%s2001_s23 + $0x48] sm:$0xff]  ;;  %v339_v31 = vld [vmem:[%s2001_s23 + $0x58] sm:$0xff] }
  0x59   : > { %1386 = vmatpush3.bf16.msra.mxu0 %v1658_v5  ;;  %1479 = vmatprep.subr.bf16.mxu1 %v1670_v24  ;;  %v362_v32 = vpack.c.bf16 %v334_v29, %v332_v28  ;;  %v365_v33 = vpack.c.bf16 %v339_v31, %v337_v30  ;;  %v336_v34 = vld [vmem:[%s2001_s23 + $0x40] sm:$0xff]  ;;  %v338_v35 = vld [vmem:[%s2001_s23 + $0x50] sm:$0xff]  ;;  %v341_v36 = vld [vmem:[%s2001_s23 + $0x68] sm:$0xff] }
  0x5a   : > { %1387 = vmatprep.subr.bf16.mxu0 %v1659_v6  ;;  %v343_v37 = vld [vmem:[%s2001_s23 + $0x78] sm:$0xff]  ;;  %v364_v38 = vpack.c.bf16 %v338_v35, %v336_v34  ;;  %v340_v40 = vld [vmem:[%s2001_s23 + $0x60] sm:$0xff]  ;;  %v342_v41 = vld [vmem:[%s2001_s23 + $0x70] sm:$0xff] }
  0x5b   : > { %v367_v39 = vpack.c.bf16 %v343_v37, %v341_v36  ;;  %v345_v42 = vld [vmem:[%s2001_s23 + $0x88] sm:$0xff]  ;;  %v347_v43 = vld [vmem:[%s2001_s23 + $0x98] sm:$0xff]  ;;  %v366_v44 = vpack.c.bf16 %v342_v41, %v340_v40  ;;  %v344_v46 = vld [vmem:[%s2001_s23 + $0x80] sm:$0xff] }
  0x5c   : > { %1480 = vmatpush3.bf16.msra.mxu1 %v1670_v24  ;;  %v369_v45 = vpack.c.bf16 %v347_v43, %v345_v42  ;;  %v346_v47 = vld [vmem:[%s2001_s23 + $0x90] sm:$0xff]  ;;  %v349_v48 = vld [vmem:[%s2001_s23 + $0xa8] sm:$0xff]  ;;  %v351_v49 = vld [vmem:[%s2001_s23 + $0xb8] sm:$0xff] }
  0x5d   : > { %1388 = vmatpush3.bf16.msra.mxu0 %v1660_v7  ;;  %1481 = vmatprep.subr.bf16.mxu1 %v1671_v25  ;;  %v368_v50 = vpack.c.bf16 %v346_v47, %v344_v46  ;;  %v371_v51 = vpack.c.bf16 %v351_v49, %v349_v48  ;;  %v348_v52 = vld [vmem:[%s2001_s23 + $0xa0] sm:$0xff]  ;;  %v350_v53 = vld [vmem:[%s2001_s23 + $0xb0] sm:$0xff]  ;;  %v353_v54 = vld [vmem:[%s2001_s23 + $0xc8] sm:$0xff] }
  0x5e   : > { %1389 = vmatprep.subr.bf16.mxu0 %v1661_v8  ;;  %v355_v55 = vld [vmem:[%s2001_s23 + $0xd8] sm:$0xff]  ;;  %v370_v56 = vpack.c.bf16 %v350_v53, %v348_v52  ;;  %v352_v58 = vld [vmem:[%s2001_s23 + $0xc0] sm:$0xff]  ;;  %v354_v59 = vld [vmem:[%s2001_s23 + $0xd0] sm:$0xff] }
  0x5f   : > { %v373_v57 = vpack.c.bf16 %v355_v55, %v353_v54  ;;  %v357_v60 = vld [vmem:[%s2001_s23 + $0xe8] sm:$0xff]  ;;  %v359_v61 = vld [vmem:[%s2001_s23 + $0xf8] sm:$0xff]  ;;  %v372_v62 = vpack.c.bf16 %v354_v59, %v352_v58  ;;  %v356_v0 = vld [vmem:[%s2001_s23 + $0xe0] sm:$0xff] }
  0x60   : > { %1482 = vmatpush3.bf16.msra.mxu1 %v1671_v25  ;;  %v375_v63 = vpack.c.bf16 %v359_v61, %v357_v60  ;;  %v358_v1 = vld [vmem:[%s2001_s23 + $0xf0] sm:$0xff]  ;;  %v1672_v3 = vld [vmem:[%s2259_s3 + $0x20] sm:$0xff]   ;;  %v1673_v4 = vld [vmem:[%s2259_s3 + $0x18] sm:$0xff]  }
  0x61   : > { %1390 = vmatpush3.bf16.msra.mxu0 %v1662_v9  ;;  %v374_v2 = vpack.c.bf16 %v358_v1, %v356_v0  ;;  %1483 = vmatprep.subr.bf16.mxu1 %v1672_v3  ;;  %v1674_v5 = vld [vmem:[%s2259_s3 + $0x10] sm:$0xff]   ;;  %v1675_v6 = vld [vmem:[%s2259_s3 + $0x8] sm:$0xff]   ;;  %v1676_v7 = vld [vmem:[%s2259_s3] sm:$0xff]  }
  0x62   : > { %1391 = vmatprep.subr.bf16.mxu0 %v1663_v10  ;;  %v1677_v8 = vld [vmem:[%s2261_s5 + $0x38] sm:$0xff]   ;;  %v2073_v13 = vld [vmem:[%s2258_s2] ss:$0 sm:$0xff]  ;;  %v1678_v36 = vld [vmem:[%s2261_s5 + $0x30] sm:$0xff]  }
  0x63   : > { %v1679_v42 = vld [vmem:[%s2261_s5 + $0x28] sm:$0xff]   ;;  %v1680_v49 = vld [vmem:[%s2261_s5 + $0x20] sm:$0xff]   ;;  %v1681_v55 = vld [vmem:[%s2261_s5 + $0x18] sm:$0xff]  }
  0x64   : > { %1484 = vmatpush3.bf16.msra.mxu1 %v1672_v3 }
  0x65   : > { %1392 = vmatpush3.bf16.msra.mxu0 %v1664_v14  ;;  %1485 = vmatprep.subr.bf16.mxu1 %v1673_v4 }
  0x66   : > { %1393 = vmatprep.subr.bf16.mxu0 %v1665_v15 }
  0x68   : > { %1486 = vmatpush3.bf16.msra.mxu1 %v1673_v4 }
  0x69   : > { %1394 = vmatpush3.bf16.msra.mxu0 %v1666_v16  ;;  %1487 = vmatprep.subr.bf16.mxu1 %v1674_v5 }
  0x6a   : > { %1395 = vmatprep.subr.bf16.mxu0 %v1667_v17 }
  0x6c   : > { %1488 = vmatpush3.bf16.msra.mxu1 %v1674_v5 }
  0x6d   : > { %1396 = vmatpush3.bf16.msra.mxu0 %v1668_v18  ;;  %1489 = vmatprep.subr.bf16.mxu1 %v1675_v6 }
  0x70   : > { %544 = vmatmul.mubr.bf16.vlgmr.msra.gmra.mxu0 %v360_v26  ;;  %1490 = vmatpush3.bf16.msra.mxu1 %v1675_v6 }
  0x71   : > { %551 = vmatprep.mubr.bf16.mxu0 %v363_v27  ;;  %1491 = vmatprep.subr.bf16.mxu1 %v1676_v7 }
  0x74   : > { %1492 = vmatpush3.bf16.msra.mxu1 %v1676_v7 }
  0x75   : > { %1509 = vmatprep.subr.bf16.mxu1 %v1677_v8 }
  0x78   : > { %552 = vmatmul.mubr.bf16.gmra.mxu0 %v362_v32 }
  0x79   : > { %559 = vmatprep.mubr.bf16.mxu0 %v365_v33 }
  0x80   : > { %560 = vmatmul.mubr.bf16.gmra.mxu0 %v364_v38 }
  0x81   : > { %567 = vmatprep.mubr.bf16.mxu0 %v367_v39 }
  0x88   : > { %568 = vmatmul.mubr.bf16.gmra.mxu0 %v366_v44 }
  0x89   : > { %575 = vmatprep.mubr.bf16.mxu0 %v369_v45 }
  0x90   : > { %576 = vmatmul.mubr.bf16.gmra.mxu0 %v368_v50 }
  0x91   : > { %583 = vmatprep.mubr.bf16.mxu0 %v371_v51 }
  0x98   : > { %584 = vmatmul.mubr.bf16.gmra.mxu0 %v370_v56 }
  0x99   : > { %591 = vmatprep.mubr.bf16.mxu0 %v373_v57 }
  0xa0   : > { %592 = vmatmul.mubr.bf16.gmra.mxu0 %v372_v62 }
  0xa1   : > { %599 = vmatprep.mubr.bf16.mxu0 %v375_v63 }
  0xa8   : > { %600 = vmatmul.mubr.bf16.gmra.mxu0 %v374_v2 }
 0x130   : > { %v1397_v9 = vpop.f32.mrf.mxu0 }
 0x132   : > { %v1398_v10 = vpop.f32.mrf.mxu0 }
 0x133   : > { %v1399_v11 = vadd.f32 %v1398_v10, %v1397_v9 }
 0x134   : > { %v1400_v12 = vpop.f32.mrf.mxu0 }
 0x135   : > { %v546_v16 = vadd.f32 %v1399_v11, %v2073_v13 }
 0x136   : > { %v1401_v14 = vpop.f32.mrf.mxu0 }
 0x137   : > { %v1402_v15 = vadd.f32 %v1401_v14, %v1400_v12  ;;  %v608_v21 = vmax.f32 %v546_v16, 0.0 }
 0x138   : > { %v1403_v17 = vpop.f32.mrf.mxu0 }
 0x139   : > { %v549_v18 = vadd.f32 %v1402_v15, %v2073_v13 }
 0x13a   : > { %v1404_v19 = vpop.f32.mrf.mxu0 }
 0x13b   : > { %v1405_v20 = vadd.f32 %v1404_v19, %v1403_v17  ;;  %v609_v22 = vmax.f32 %v549_v18, 0.0 }
 0x13c   : > { %v1406_v23 = vpop.f32.mrf.mxu0 }
 0x13d   : > { %v624_v24 = vpack.c.bf16 %v609_v22, %v608_v21  ;;  %v554_v26 = vadd.f32 %v1405_v20, %v2073_v13 }
 0x13e   : > { %v1407_v25 = vpop.f32.mrf.mxu0 }
 0x13f   : > { %v1408_v27 = vadd.f32 %v1407_v25, %v1406_v23  ;;  %1493 = vmatprep.mubr.bf16.mxu1 %v624_v24  ;;  %v610_v31 = vmax.f32 %v554_v26, 0.0 }
 0x140   : > { %v1409_v28 = vpop.f32.mrf.mxu0 }
 0x141   : > { %v557_v29 = vadd.f32 %v1408_v27, %v2073_v13 }
 0x142   : > { %v1410_v30 = vpop.f32.mrf.mxu0 }
 0x143   : > { %v611_v32 = vmax.f32 %v557_v29, 0.0  ;;  %v1411_v33 = vadd.f32 %v1410_v30, %v1409_v28 }
 0x144   : > { %v1412_v34 = vpop.f32.mrf.mxu0 }
 0x145   : > { %v625_v35 = vpack.c.bf16 %v611_v32, %v610_v31  ;;  %v562_v38 = vadd.f32 %v1411_v33, %v2073_v13 }
 0x146   : > { %v1413_v37 = vpop.f32.mrf.mxu0 }
 0x147   : > { %v1414_v39 = vadd.f32 %v1413_v37, %v1412_v34  ;;  %1494 = vmatmul.mubr.bf16.vlgmr.msra.gmra.mxu1 %v625_v35  ;;  %v612_v44 = vmax.f32 %v562_v38, 0.0 }
 0x148   : > { %v1415_v40 = vpop.f32.mrf.mxu0  ;;  %1510 = vmatpush3.bf16.msra.mxu1 %v1677_v8 }
 0x149   : > { %v565_v41 = vadd.f32 %v1414_v39, %v2073_v13  ;;  %1511 = vmatprep.subr.bf16.mxu1 %v1678_v36  ;;  %v1682_v39 = vld [vmem:[%s2261_s5 + $0x10] sm:$0xff]  }
 0x14a   : > { %v1416_v43 = vpop.f32.mrf.mxu0 }
 0x14b   : > { %v613_v45 = vmax.f32 %v565_v41, 0.0  ;;  %v1417_v46 = vadd.f32 %v1416_v43, %v1415_v40  ;;  %v1683_v40 = vld [vmem:[%s2261_s5 + $0x8] sm:$0xff]   ;;  %v1340_v43 = vld [vmem:[%s2260_s4] ss:$0 sm:$0xff] }
 0x14c   : > { %v1418_v47 = vpop.f32.mrf.mxu0  ;;  %1512 = vmatpush3.bf16.msra.mxu1 %v1678_v36 }
 0x14d   : > { %v626_v48 = vpack.c.bf16 %v613_v45, %v612_v44  ;;  %1513 = vmatprep.subr.bf16.mxu1 %v1679_v42  ;;  %v570_v51 = vadd.f32 %v1417_v46, %v2073_v13 }
 0x14e   : > { %v1419_v50 = vpop.f32.mrf.mxu0 }
 0x14f   : > { %v1420_v52 = vadd.f32 %v1419_v50, %v1418_v47  ;;  %1497 = vmatprep.mubr.bf16.mxu1 %v626_v48  ;;  %v614_v57 = vmax.f32 %v570_v51, 0.0 }
 0x150   : > { %v1421_v53 = vpop.f32.mrf.mxu0  ;;  %1514 = vmatpush3.bf16.msra.mxu1 %v1679_v42 }
 0x151   : > { %v573_v54 = vadd.f32 %v1420_v52, %v2073_v13  ;;  %1515 = vmatprep.subr.bf16.mxu1 %v1680_v49 }
 0x152   : > { %v1422_v56 = vpop.f32.mrf.mxu0 }
 0x153   : > { %v615_v58 = vmax.f32 %v573_v54, 0.0  ;;  %v1423_v59 = vadd.f32 %v1422_v56, %v1421_v53 }
 0x154   : > { %v1424_v60 = vpop.f32.mrf.mxu0  ;;  %1516 = vmatpush3.bf16.msra.mxu1 %v1680_v49 }
 0x155   : > { %v627_v61 = vpack.c.bf16 %v615_v58, %v614_v57  ;;  %1517 = vmatprep.subr.bf16.mxu1 %v1681_v55  ;;  %v578_v63 = vadd.f32 %v1423_v59, %v2073_v13 }
 0x156   : > { %v1425_v62 = vpop.f32.mrf.mxu0 }
 0x157   : > { %v1426_v0 = vadd.f32 %v1425_v62, %v1424_v60  ;;  %1498 = vmatmul.mubr.bf16.gmra.mxu1 %v627_v61  ;;  %v616_v4 = vmax.f32 %v578_v63, 0.0 }
 0x158   : > { %v1427_v1 = vpop.f32.mrf.mxu0  ;;  %1518 = vmatpush3.bf16.msra.mxu1 %v1681_v55 }
 0x159   : > { %v581_v2 = vadd.f32 %v1426_v0, %v2073_v13  ;;  %1519 = vmatprep.subr.bf16.mxu1 %v1682_v39 }
 0x15a   : > { %v1428_v3 = vpop.f32.mrf.mxu0 }
 0x15b   : > { %v617_v5 = vmax.f32 %v581_v2, 0.0  ;;  %v1429_v6 = vadd.f32 %v1428_v3, %v1427_v1 }
 0x15c   : > { %v1430_v7 = vpop.f32.mrf.mxu0  ;;  %1520 = vmatpush3.bf16.msra.mxu1 %v1682_v39 }
 0x15d   : > { %v628_v8 = vpack.c.bf16 %v617_v5, %v616_v4  ;;  %v586_v10 = vadd.f32 %v1429_v6, %v2073_v13  ;;  %1521 = vmatprep.subr.bf16.mxu1 %v1683_v40 }
 0x15e   : > { %v1431_v9 = vpop.f32.mrf.mxu0 }
 0x15f   : > { %v1432_v11 = vadd.f32 %v1431_v9, %v1430_v7  ;;  %1501 = vmatprep.mubr.bf16.mxu1 %v628_v8  ;;  %v618_v16 = vmax.f32 %v586_v10, 0.0 }
 0x160   : > { %v1433_v12 = vpop.f32.mrf.mxu0  ;;  %1522 = vmatpush3.bf16.msra.mxu1 %v1683_v40 }
 0x161   : > { %v589_v14 = vadd.f32 %v1432_v11, %v2073_v13 }
 0x162   : > { %v1434_v15 = vpop.f32.mrf.mxu0 }
 0x163   : > { %v619_v17 = vmax.f32 %v589_v14, 0.0  ;;  %v1435_v18 = vadd.f32 %v1434_v15, %v1433_v12 }
 0x164   : > { %v1436_v19 = vpop.f32.mrf.mxu0 }
 0x165   : > { %v629_v20 = vpack.c.bf16 %v619_v17, %v618_v16  ;;  %v594_v22 = vadd.f32 %v1435_v18, %v2073_v13 }
 0x166   : > { %v1437_v21 = vpop.f32.mrf.mxu0 }
 0x167   : > { %v1438_v23 = vadd.f32 %v1437_v21, %v1436_v19  ;;  %1502 = vmatmul.mubr.bf16.gmra.mxu1 %v629_v20  ;;  %v620_v27 = vmax.f32 %v594_v22, 0.0 }
 0x168   : > { %v1439_v24 = vpop.f32.mrf.mxu0 }
 0x169   : > { %v597_v25 = vadd.f32 %v1438_v23, %v2073_v13 }
 0x16a   : > { %v1440_v26 = vpop.f32.mrf.mxu0 }
 0x16b   : > { %v621_v28 = vmax.f32 %v597_v25, 0.0  ;;  %v1441_v29 = vadd.f32 %v1440_v26, %v1439_v24 }
 0x16c   : > { %v1442_v30 = vpop.f32.mrf.mxu0 }
 0x16d   : > { %v630_v31 = vpack.c.bf16 %v621_v28, %v620_v27  ;;  %v602_v33 = vadd.f32 %v1441_v29, %v2073_v13 }
 0x16e   : > { %v1443_v32 = vpop.f32.mrf.mxu0 }
 0x16f   : > { %v1444_v34 = vadd.f32 %v1443_v32, %v1442_v30  ;;  %1505 = vmatprep.mubr.bf16.mxu1 %v630_v31  ;;  %v622_v36 = vmax.f32 %v602_v33, 0.0 }
 0x171   : > { %v605_v35 = vadd.f32 %v1444_v34, %v2073_v13  ;;  %v1684_v13 = vld [vmem:[%s2261_s5] sm:$0xff]  }
 0x172   : > { %1523 = vmatprep.subr.bf16.mxu1 %v1684_v13 }
 0x173   : > { %v623_v37 = vmax.f32 %v605_v35, 0.0  ;;  %1524 = vmatpush3.bf16.msra.mxu1 %v1684_v13  ;;  %v1349_v35 = vld [vmem:[%s2262_s6] ss:$0 sm:$0xff] }
 0x175   : > { %v631_v38 = vpack.c.bf16 %v623_v37, %v622_v36 }
 0x177   : > { %1506 = vmatmul.mubr.bf16.gmra.mxu1 %v631_v38 }
 0x207   : > { %v1495_v41 = vpop.f32.mrf.mxu1 }
 0x208   : > { %v746_v47 = vadd.f32 %v1495_v41, %v1340_v43 }
 0x209   : > { %v737_v42 = vpop.f32.mrf.mxu1 }
 0x20a   : > { %v738_v45 = vadd.f32 %v1340_v43, %v737_v42  ;;  %v802_v53 = vmax.f32 %v746_v47, 0.0 }
 0x20b   : > { %v1496_v44 = vpop.f32.mrf.mxu1 }
 0x20c   : > { %v749_v46 = vadd.f32 %v1496_v44, %v1340_v43  ;;  %v800_v51 = vmax.f32 %v738_v45, 0.0 }
 0x20d   : > { %v740_v48 = vpop.f32.mrf.mxu1 }
 0x20e   : > { %v741_v49 = vadd.f32 %v1340_v43, %v740_v48  ;;  %v803_v50 = vmax.f32 %v749_v46, 0.0 }
 0x210   : > { %v801_v52 = vmax.f32 %v741_v49, 0.0  ;;  %v817_v55 = vpack.c.bf16 %v803_v50, %v802_v53 }
 0x212   : > { %v816_v54 = vpack.c.bf16 %v801_v52, %v800_v51 }
 0x214   : > { %1525 = vmatprep.mubr.bf16.mxu1 %v816_v54 }
 0x215   : > { %1526 = vmatmul.mubr.bf16.vlgmr.msra.gmra.mxu1 %v817_v55 }
 0x217   : > { %v1499_v56 = vpop.f32.mrf.mxu1 }
 0x218   : > { %v762_v61 = vadd.f32 %v1499_v56, %v1340_v43 }
 0x219   : > { %v753_v57 = vpop.f32.mrf.mxu1 }
 0x21a   : > { %v754_v59 = vadd.f32 %v1340_v43, %v753_v57  ;;  %v806_v3 = vmax.f32 %v762_v61, 0.0 }
 0x21b   : > { %v1500_v58 = vpop.f32.mrf.mxu1 }
 0x21c   : > { %v765_v60 = vadd.f32 %v1500_v58, %v1340_v43  ;;  %v804_v1 = vmax.f32 %v754_v59, 0.0 }
 0x21d   : > { %v756_v62 = vpop.f32.mrf.mxu1 }
 0x21e   : > { %v757_v63 = vadd.f32 %v1340_v43, %v756_v62  ;;  %v807_v0 = vmax.f32 %v765_v60, 0.0 }
 0x220   : > { %v805_v2 = vmax.f32 %v757_v63, 0.0  ;;  %v819_v5 = vpack.c.bf16 %v807_v0, %v806_v3 }
 0x222   : > { %v818_v4 = vpack.c.bf16 %v805_v2, %v804_v1 }
 0x224   : > { %1529 = vmatprep.mubr.bf16.mxu1 %v818_v4 }
 0x225   : > { %1530 = vmatmul.mubr.bf16.gmra.mxu1 %v819_v5 }
 0x227   : > { %v1503_v6 = vpop.f32.mrf.mxu1 }
 0x228   : > { %v778_v11 = vadd.f32 %v1503_v6, %v1340_v43 }
 0x229   : > { %v769_v7 = vpop.f32.mrf.mxu1 }
 0x22a   : > { %v770_v9 = vadd.f32 %v1340_v43, %v769_v7  ;;  %v810_v18 = vmax.f32 %v778_v11, 0.0 }
 0x22b   : > { %v1504_v8 = vpop.f32.mrf.mxu1 }
 0x22c   : > { %v781_v10 = vadd.f32 %v1504_v8, %v1340_v43  ;;  %v808_v16 = vmax.f32 %v770_v9, 0.0 }
 0x22d   : > { %v772_v12 = vpop.f32.mrf.mxu1 }
 0x22e   : > { %v773_v14 = vadd.f32 %v1340_v43, %v772_v12  ;;  %v811_v15 = vmax.f32 %v781_v10, 0.0 }
 0x230   : > { %v809_v17 = vmax.f32 %v773_v14, 0.0  ;;  %v821_v20 = vpack.c.bf16 %v811_v15, %v810_v18 }
 0x232   : > { %v820_v19 = vpack.c.bf16 %v809_v17, %v808_v16 }
 0x234   : > { %1533 = vmatprep.mubr.bf16.mxu1 %v820_v19 }
 0x235   : > { %1534 = vmatmul.mubr.bf16.gmra.mxu1 %v821_v20 }
 0x237   : > { %v1507_v21 = vpop.f32.mrf.mxu1 }
 0x238   : > { %v794_v26 = vadd.f32 %v1507_v21, %v1340_v43 }
 0x239   : > { %v785_v22 = vpop.f32.mrf.mxu1 }
 0x23a   : > { %v786_v24 = vadd.f32 %v1340_v43, %v785_v22  ;;  %v814_v32 = vmax.f32 %v794_v26, 0.0 }
 0x23b   : > { %v1508_v23 = vpop.f32.mrf.mxu1 }
 0x23c   : > { %v797_v25 = vadd.f32 %v1508_v23, %v1340_v43  ;;  %v812_v30 = vmax.f32 %v786_v24, 0.0 }
 0x23d   : > { %v788_v27 = vpop.f32.mrf.mxu1 }
 0x23e   : > { %v789_v28 = vadd.f32 %v1340_v43, %v788_v27  ;;  %v815_v29 = vmax.f32 %v797_v25, 0.0 }
 0x240   : > { %v813_v31 = vmax.f32 %v789_v28, 0.0  ;;  %v823_v34 = vpack.c.bf16 %v815_v29, %v814_v32 }
 0x242   : > { %v822_v33 = vpack.c.bf16 %v813_v31, %v812_v30 }
 0x244   : > { %1537 = vmatprep.mubr.bf16.mxu1 %v822_v33 }
 0x245   : > { %1538 = vmatmul.mubr.bf16.gmra.mxu1 %v823_v34 }
 0x2d5   : > { %v1527_v36 = vpop.f32.mrf.mxu1 }
 0x2d6   : > { %v938_v37 = vadd.f32 %v1527_v36, %v1349_v35 }
 0x2d7   : > { %v929_v38 = vpop.f32.mrf.mxu1 }
 0x2d8   : > { %995 = vst.msk [vmem:[%s2119_s8 + $0x10] sm:$0xff] %vm992_vm0, %v938_v37  ;;  %v930_v39 = vadd.f32 %v1349_v35, %v929_v38 }
 0x2d9   : > { %v1528_v40 = vpop.f32.mrf.mxu1 }
 0x2da   : > { %993 = vst.msk [vmem:[%s2119_s8] sm:$0xff] %vm992_vm0, %v930_v39  ;;  %v941_v13 = vadd.f32 %v1528_v40, %v1349_v35 }
 0x2db   : > { %v932_v41 = vpop.f32.mrf.mxu1 }
 0x2dc   : > { %996 = vst.msk [vmem:[%s2119_s8 + $0x18] sm:$0xff] %vm992_vm0, %v941_v13  ;;  %v933_v42 = vadd.f32 %v1349_v35, %v932_v41 }
 0x2de   : > { %994 = vst.msk [vmem:[%s2119_s8 + $0x8] sm:$0xff] %vm992_vm0, %v933_v42 }
 0x2e5   : > { %v1531_v43 = vpop.f32.mrf.mxu1 }
 0x2e6   : > { %v954_v44 = vadd.f32 %v1531_v43, %v1349_v35 }
 0x2e7   : > { %v945_v45 = vpop.f32.mrf.mxu1 }
 0x2e8   : > { %999 = vst.msk [vmem:[%s2119_s8 + $0x30] sm:$0xff] %vm992_vm0, %v954_v44  ;;  %v946_v46 = vadd.f32 %v1349_v35, %v945_v45 }
 0x2e9   : > { %v1532_v47 = vpop.f32.mrf.mxu1 }
 0x2ea   : > { %997 = vst.msk [vmem:[%s2119_s8 + $0x20] sm:$0xff] %vm992_vm0, %v946_v46  ;;  %v957_v48 = vadd.f32 %v1532_v47, %v1349_v35 }
 0x2eb   : > { %v948_v49 = vpop.f32.mrf.mxu1 }
 0x2ec   : > { %1000 = vst.msk [vmem:[%s2119_s8 + $0x38] sm:$0xff] %vm992_vm0, %v957_v48  ;;  %v949_v50 = vadd.f32 %v1349_v35, %v948_v49 }
 0x2ee   : > { %998 = vst.msk [vmem:[%s2119_s8 + $0x28] sm:$0xff] %vm992_vm0, %v949_v50 }
 0x2f5   : > { %v1535_v51 = vpop.f32.mrf.mxu1 }
 0x2f6   : > { %v970_v52 = vadd.f32 %v1535_v51, %v1349_v35 }
 0x2f7   : > { %v961_v53 = vpop.f32.mrf.mxu1 }
 0x2f8   : > { %1003 = vst.msk [vmem:[%s2119_s8 + $0x50] sm:$0xff] %vm992_vm0, %v970_v52  ;;  %v962_v54 = vadd.f32 %v1349_v35, %v961_v53 }
 0x2f9   : > { %v1536_v55 = vpop.f32.mrf.mxu1 }
 0x2fa   : > { %1001 = vst.msk [vmem:[%s2119_s8 + $0x40] sm:$0xff] %vm992_vm0, %v962_v54  ;;  %v973_v56 = vadd.f32 %v1536_v55, %v1349_v35 }
 0x2fb   : > { %v964_v57 = vpop.f32.mrf.mxu1 }
 0x2fc   : > { %1004 = vst.msk [vmem:[%s2119_s8 + $0x58] sm:$0xff] %vm992_vm0, %v973_v56  ;;  %v965_v58 = vadd.f32 %v1349_v35, %v964_v57 }
 0x2fe   : > { %1002 = vst.msk [vmem:[%s2119_s8 + $0x48] sm:$0xff] %vm992_vm0, %v965_v58 }
 0x305   : > { %v1539_v59 = vpop.f32.mrf.mxu1 }
 0x306   : > { %v986_v60 = vadd.f32 %v1539_v59, %v1349_v35 }
 0x307   : > { %v977_v61 = vpop.f32.mrf.mxu1 }
 0x308   : > { %1007 = vst.msk [vmem:[%s2119_s8 + $0x70] sm:$0xff] %vm992_vm0, %v986_v60  ;;  %v978_v62 = vadd.f32 %v1349_v35, %v977_v61 }
 0x309   : > { %v1540_v63 = vpop.f32.mrf.mxu1 }
 0x30a   : > { %1005 = vst.msk [vmem:[%s2119_s8 + $0x60] sm:$0xff] %vm992_vm0, %v978_v62  ;;  %v989_v0 = vadd.f32 %v1540_v63, %v1349_v35  ;;  %1015 = sbr.rel (!%p2270_p5) target bundleno = 824 (0x338), region = 60 }
 0x30b   : > { %v980_v1 = vpop.f32.mrf.mxu1 }
 0x30c   : > { %1008 = vst.msk [vmem:[%s2119_s8 + $0x78] sm:$0xff] %vm992_vm0, %v989_v0  ;;  %v981_v2 = vadd.f32 %v1349_v35, %v980_v1 }
 0x30e   : > { %1006 = vst.msk [vmem:[%s2119_s8 + $0x68] sm:$0xff] %vm992_vm0, %v981_v2 }
 0x30f   : > { %s2281_s10 = smov (!%p1018_p11, %s1017_s10), 16 }
 0x310   : > { %s1360_s22 = sshll.u32 %s2281_s10, 7 }
 0x311   : > { %p1363_p4 = scmp.eq.s32.totalorder %s1360_s22, 0 }
 0x312   : > { %s2166_s12 = sshrl.u32 (!%p1363_p4), %s2281_s10, 4 }
 0x313   : > { %1026 = sbr.rel (%p1363_p4) target bundleno = 824 (0x338), region = 64  ;;  %p1364_p2 = scmp.le.s32.totalorder (!%p1363_p4), %s2166_s12, 0 }
 0x318   : > { %1250 = sbr.rel (%p1364_p2) target bundleno = 807 (0x327), region = 146  ;;  %s2271_s28 = smov (!%p1364_p2), %s2160_s20 }
 0x319   : > { %s2272_s27 = smov (!%p1364_p2), %s2119_s8  ;;  %s2175_s23 = smov (!%p1364_p2), 0  }
 0x31a   : > { %s2177_s11 = smov (!%p1364_p2), 0  }
 0x31d LB: >> { %v1119_v3 = vld [vmem:[%s1815_s27] sm:$0xff]  ;;  %v1121_v4 = vld [vmem:[%s1815_s27 + $0x8] sm:$0xff]  ;;  %v1123_v5 = vld [vmem:[%s1815_s27 + $0x10] sm:$0xff]  ;;  %s1151_s13 = sadd.s32 1, %s1819_s23  ;;  %s1113_s11 = sadd.s32 1, %s1823_s11   ;;  %s1823_s11 = sphi %s2177_s11, %s1113_s11   ;;  %s1819_s23 = sphi %s2175_s23, %s2273_s23   ;;  %s1815_s27 = sphi %s2272_s27, %s1156_s27   ;;  %s1811_s28 = sphi %s2271_s28, %s1157_s28  }
 0x31e   : >> { %1120 = vst [vmem:[%s1811_s28] sm:$0xff] %v1119_v3  ;;  %1122 = vst [vmem:[%s1811_s28 + $0x8] sm:$0xff] %v1121_v4  ;;  %v1125_v6 = vld [vmem:[%s1815_s27 + $0x18] sm:$0xff]  ;;  %v1127_v7 = vld [vmem:[%s1815_s27 + $0x20] sm:$0xff]  ;;  %p1152_p3 = scmp.ge.s32.totalorder %s1151_s13, %s2166_s12  ;;  %p1112_p1 = scmp.ge.s32.totalorder %s1113_s11, %s2166_s12 }
 0x31f   : >> { %1124 = vst [vmem:[%s1811_s28 + $0x10] sm:$0xff] %v1123_v5  ;;  %v1129_v8 = vld [vmem:[%s1815_s27 + $0x28] sm:$0xff]  ;;  %1126 = vst [vmem:[%s1811_s28 + $0x18] sm:$0xff] %v1125_v6  ;;  %v1131_v9 = vld [vmem:[%s1815_s27 + $0x30] sm:$0xff] }
 0x320   : >> { %1128 = vst [vmem:[%s1811_s28 + $0x20] sm:$0xff] %v1127_v7  ;;  %1130 = vst [vmem:[%s1811_s28 + $0x28] sm:$0xff] %v1129_v8  ;;  %v1133_v10 = vld [vmem:[%s1815_s27 + $0x38] sm:$0xff]  ;;  %v1135_v11 = vld [vmem:[%s1815_s27 + $0x40] sm:$0xff]  ;;  %s2283_s13 = smov (%p1152_p3, %s1151_s13), 0 }
 0x321   : >> { %1132 = vst [vmem:[%s1811_s28 + $0x30] sm:$0xff] %v1131_v9  ;;  %1134 = vst [vmem:[%s1811_s28 + $0x38] sm:$0xff] %v1133_v10  ;;  %v1137_v12 = vld [vmem:[%s1815_s27 + $0x48] sm:$0xff]  ;;  %v1139_v14 = vld [vmem:[%s1815_s27 + $0x50] sm:$0xff]  ;;  %s1365_s30 = sshll.u32 %s2283_s13, 7  ;;  %s2273_s23 = smov %s2283_s13 }
 0x322   : >> { %1136 = vst [vmem:[%s1811_s28 + $0x40] sm:$0xff] %v1135_v11  ;;  %v1141_v15 = vld [vmem:[%s1815_s27 + $0x58] sm:$0xff]  ;;  %1138 = vst [vmem:[%s1811_s28 + $0x48] sm:$0xff] %v1137_v12  ;;  %v1143_v16 = vld [vmem:[%s1815_s27 + $0x60] sm:$0xff]  ;;  %1115 = sbr.rel (!%p1112_p1) target bundleno = 797 (0x31d), region = 152 }
 0x323   : >> { %1140 = vst [vmem:[%s1811_s28 + $0x50] sm:$0xff] %v1139_v14  ;;  %1142 = vst [vmem:[%s1811_s28 + $0x58] sm:$0xff] %v1141_v15  ;;  %v1145_v17 = vld [vmem:[%s1815_s27 + $0x68] sm:$0xff]  ;;  %v1147_v18 = vld [vmem:[%s1815_s27 + $0x70] sm:$0xff] }
 0x324   : >> { %1144 = vst [vmem:[%s1811_s28 + $0x60] sm:$0xff] %v1143_v16  ;;  %1146 = vst [vmem:[%s1811_s28 + $0x68] sm:$0xff] %v1145_v17  ;;  %v1149_v19 = vld [vmem:[%s1815_s27 + $0x78] sm:$0xff]  ;;  %s1156_s27 = scalar_lea.vmem %s2119_s8, %s1365_s30 [#allocation6]  }
 0x325   : >> { %1148 = vst [vmem:[%s1811_s28 + $0x70] sm:$0xff] %v1147_v18  ;;  %1150 = vst [vmem:[%s1811_s28 + $0x78] sm:$0xff] %v1149_v19  ;;  %s1157_s28 = scalar_lea.vmem %s2160_s20, %s1365_s30  }
 0x327 PF: > { %s2235_s14 = sand.u32 15, %s2281_s10   ;;  %s1379_s18 = sshll.u32 %s2166_s12, 7 }
 0x328   : > { %s1162_s19 = scalar_lea.vmem %s2119_s8, %s1379_s18 [#allocation6]   ;;  %s1164_s24 = scalar_lea.vmem %s2160_s20, %s1379_s18  }
 0x329   : > { %p1370_p6 = scmp.le.s32.totalorder %s2235_s14, 0 }
 0x32a   : > { %s1825_s21 = smov (!%p1370_p6), %s1164_s24   ;;  %s1829_s15 = smov (!%p1370_p6), %s1162_s19  }
 0x32b   : > { %1264 = sbr.rel (%p1370_p6) target bundleno = 824 (0x338), region = 157  ;;  %s1833_s16 = smov (!%p1370_p6), 0  }
 0x32c   : > { %s1837_s17 = smov (!%p1370_p6), 0  }
 0x330 LB: >> { %v1174_v20 = vld [vmem:[%s1831_s15] sm:$0xff]  ;;  %s1176_s10 = sadd.s32 1, %s1835_s16  ;;  %s1168_s17 = sadd.s32 1, %s1839_s17   ;;  %s1839_s17 = sphi %s1837_s17, %s1168_s17   ;;  %s1835_s16 = sphi %s1833_s16, %s1834_s16   ;;  %s1831_s15 = sphi %s1829_s15, %s1181_s15   ;;  %s1827_s21 = sphi %s1825_s21, %s1182_s21  }
 0x331   : >> { %1175 = vst [vmem:[%s1827_s21] sm:$0xff] %v1174_v20  ;;  %p1177_p7 = scmp.ge.s32.totalorder %s1176_s10, %s2235_s14  ;;  %p1167_p9 = scmp.ge.s32.totalorder %s1168_s17, %s2235_s14 }
 0x333   : >> { %s2285_s10 = smov (%p1177_p7, %s1176_s10), 0  ;;  %1170 = sbr.rel (!%p1167_p9) target bundleno = 816 (0x330), region = 163 }
 0x334   : >> { %s1371_s8 = sshll.u32 %s2285_s10, 3  ;;  %s1834_s16 = smov %s2285_s10  }
 0x335   : >> { %s1181_s15 = scalar_lea.vmem %s1162_s19, %s1371_s8 [#allocation6]   ;;  %s1182_s21 = scalar_lea.vmem %s1164_s24, %s1371_s8  }
 0x338 PF: > { %p18_p8 = scmp.ge.s32.totalorder %s1909_s29, 4   ;;  %s2274_s24 = smov %s1799_s25 }
 0x339   : > { %s2275_s25 = smov %s1803_s26  ;;  %s2276_s26 = smov %s1919_s9 }
 0x33a   : > { %s2277_s27 = smov %s1909_s29  ;;  %20 = sbr.rel (!%p18_p8) target bundleno = 4 (0x4), region = 174 }
 0x33f   :  { %1198 = vsyncpa [#allocation3], 1 }
 0x340   :  { %1200 = vsyncpa [#allocation3 + $0x1], 1 }
 0x341   :  { %1201 = vsyncpa [#allocation5], 1 }

</bundles_post_ra>
